<compile_context>
chip_gen: v7x
topology: tpu7x:2x2x1
jax: 0.10.0
libtpu: 0.0.40
codegen_flags: <defaults>
</compile_context>

<pallas_src>
import functools

import jax
import jax.numpy as jnp
from jax.experimental import pallas as pl
from jax.experimental.pallas import tpu as pltpu

BN_EPS = 1e-5
LANE = 128


def _round_up(v, m):
    return ((v + m - 1) // m) * m


def _pad2(a, rows, cols):
    return jnp.pad(a, ((0, rows - a.shape[0]), (0, cols - a.shape[1])))


def _pad1(a, cols):
    return jnp.pad(a, ((0, cols - a.shape[0]),))


# ----------------------------- Pallas kernel --------------------------------

def fused_gcn_kernel(a_ref, x_ref, w_ref, gamma_ref, beta_ref, p_ref, lw_ref,
                     lb_ref, o_ref, h_cur, xw, h_next, s_sum, s_sq, *, inv_n):
    """Grid = (num_layers, num_row_tiles); both axes 'arbitrary' (sequential).

    Scratch (persistent across the grid):
      h_cur  [N_pad, D] bf16 : current layer input (X, then BN+ReLU outputs)
      xw     [N_pad, D] bf16 : X @ W for the current layer
      h_next [N_pad, D] f32  : pre-BatchNorm aggregation output
      s_sum, s_sq [1, D] f32 : per-feature sum / sum-of-squares (BN stats)
    """
    l = pl.program_id(0)
    r = pl.program_id(1)
    num_layers = pl.num_programs(0)
    num_row_tiles = pl.num_programs(1)
    tm = a_ref.shape[0]

    # Very first grid step: stage the padded node features into VMEM.
    @pl.when((l == 0) & (r == 0))
    def _():
        h_cur[...] = x_ref[...]

    # Per-layer prologue (first row tile): dense X @ W (PyG order: the narrow
    # projection happens before the N x N aggregation); zero the BN stats.
    @pl.when(r == 0)
    def _():
        xw[...] = jnp.dot(h_cur[...], w_ref[0],
                          preferred_element_type=jnp.float32
                          ).astype(jnp.bfloat16)
        s_sum[...] = jnp.zeros_like(s_sum)
        s_sq[...] = jnp.zeros_like(s_sq)

    # Aggregate this row tile of A_hat @ (X @ W); accumulate BN statistics.
    agg = jnp.dot(a_ref[...], xw[...], preferred_element_type=jnp.float32)
    row0 = pl.multiple_of(r * tm, tm)
    h_next[pl.ds(row0, tm), :] = agg
    s_sum[...] += jnp.sum(agg, axis=0, keepdims=True)
    s_sq[...] += jnp.sum(agg * agg, axis=0, keepdims=True)

    # Per-layer epilogue (last row tile): finalize BatchNorm (training-mode
    # batch statistics, biased variance) + ReLU; write next layer's input.
    # Zero-padded node rows contribute exactly zero to s_sum/s_sq, so dividing
    # by the real node count keeps the statistics exact.
    @pl.when(r == num_row_tiles - 1)
    def _():
        mean = s_sum[...] * inv_n                                   # [1, D]
        var = jnp.maximum(s_sq[...] * inv_n - mean * mean, 0.0)     # [1, D]
        scale = gamma_ref[0] * jax.lax.rsqrt(var + BN_EPS)          # [1, D]
        shift = beta_ref[0] - mean * scale                          # [1, D]
        h_cur[...] = jnp.maximum(h_next[...] * scale + shift,
                                 0.0).astype(jnp.bfloat16)

    # Final grid step: fused global_mean_pool (as a matmul with the
    # precomputed pooling matrix) + Linear head.
    @pl.when((l == num_layers - 1) & (r == num_row_tiles - 1))
    def _():
        pooled = jnp.dot(p_ref[...], h_cur[...],
                         preferred_element_type=jnp.float32)
        o_ref[...] = (jnp.dot(pooled.astype(jnp.bfloat16), lw_ref[...],
                              preferred_element_type=jnp.float32)
                      + lb_ref[...])


# ------------------------------- JAX glue -----------------------------------

def build_a_hat(edge_index, num_nodes):
    """Dense GCN-normalized adjacency: A_hat = D^-1/2 (A + I) D^-1/2.

    Matches PyG gcn_norm: row=src(j), col=dst(i), degrees at dst, messages
    aggregated at dst -> A_hat[i, j] = d_i^-1/2 * d_j^-1/2.
    """
    src = edge_index[0]
    dst = edge_index[1]
    loops = jnp.arange(num_nodes, dtype=src.dtype)
    src = jnp.concatenate([src, loops])
    dst = jnp.concatenate([dst, loops])
    ew = jnp.ones(src.shape[0], dtype=jnp.float32)
    deg = jnp.zeros((num_nodes,), dtype=jnp.float32).at[dst].add(ew)
    dinv = jnp.where(deg > 0, jax.lax.rsqrt(deg), 0.0)
    norm = dinv[src] * ew * dinv[dst]
    a = jnp.zeros((num_nodes, num_nodes), dtype=jnp.float32)
    a = a.at[dst, src].add(norm)
    return a


def build_mean_pool_matrix(batch, num_graphs):
    onehot = (batch[None, :] == jnp.arange(num_graphs)[:, None]).astype(jnp.float32)
    counts = jnp.maximum(onehot.sum(axis=1, keepdims=True), 1.0)
    return onehot / counts


def init_params(key, num_node_features, hidden_channels, num_out_features,
                num_message_passes):
    layers = []
    dims_in = [num_node_features] + [hidden_channels] * (num_message_passes - 1)
    for d_in in dims_in:
        key, k_w = jax.random.split(key)
        # glorot-uniform like PyG GCNConv weight init.
        limit = jnp.sqrt(6.0 / (d_in + hidden_channels))
        w = jax.random.uniform(k_w, (d_in, hidden_channels), jnp.float32,
                               -limit, limit)
        gamma = jnp.ones((hidden_channels,), jnp.float32)   # BatchNorm weight
        beta = jnp.zeros((hidden_channels,), jnp.float32)   # BatchNorm bias
        # GCNConv bias omitted: zero-initialized in PyG and canceled by the
        # BatchNorm mean subtraction that follows.
        layers.append((w, gamma, beta))
    key, k_lw, k_lb = jax.random.split(key, 3)
    limit = 1.0 / jnp.sqrt(hidden_channels)
    lin_w = jax.random.uniform(k_lw, (hidden_channels, num_out_features),
                               jnp.float32, -limit, limit)
    lin_b = jax.random.uniform(k_lb, (num_out_features,), jnp.float32,
                               -limit, limit)
    return {"layers": layers, "lin_w": lin_w, "lin_b": lin_b}


@functools.partial(jax.jit, static_argnames=("num_graphs", "tm"))
def gcn_conv_model_forward(params, x, edge_index, batch, num_graphs, tm=128):
    n, f = x.shape
    layers = params["layers"]
    num_layers = len(layers)
    hidden = layers[0][0].shape[1]
    num_out = params["lin_w"].shape[1]

    d = _round_up(max(f, hidden, num_out), LANE)   # lane-dense feature width
    n_pad = _round_up(n, tm)                       # row-tile-aligned node count
    g_pad = _round_up(num_graphs, 8)               # sublane-aligned graph count

    # Graph glue in plain JAX (zero padding keeps kernel math exact).
    a_hat = _pad2(build_a_hat(edge_index, n), n_pad, n_pad).astype(jnp.bfloat16)
    x_p = _pad2(x, n_pad, d).astype(jnp.bfloat16)
    p_pad = _pad2(build_mean_pool_matrix(batch, num_graphs),
                  g_pad, n_pad).astype(jnp.bfloat16)

    w_stack = jnp.stack([_pad2(w, d, d) for (w, _, _) in layers]
                        ).astype(jnp.bfloat16)                       # [L, D, D]
    gamma_stack = jnp.stack([_pad1(g, d) for (_, g, _) in layers])[:, None, :]
    beta_stack = jnp.stack([_pad1(b, d) for (_, _, b) in layers])[:, None, :]

    lw = _pad2(params["lin_w"], d, d).astype(jnp.bfloat16)
    lb = _pad1(params["lin_b"], d)[None, :]

    grid = (num_layers, n_pad // tm)
    kernel = functools.partial(fused_gcn_kernel, inv_n=1.0 / n)

    out_pad = pl.pallas_call(
        kernel,
        out_shape=jax.ShapeDtypeStruct((g_pad, d), jnp.float32),
        grid_spec=pltpu.PrefetchScalarGridSpec(
            num_scalar_prefetch=0,
            grid=grid,
            in_specs=[
                # A_hat: streamed as (tm, N_pad) row tiles (reduction over cols
                # happens inside one MXU contraction); re-visited per layer.
                pl.BlockSpec((tm, n_pad), lambda l, r: (r, 0)),
                # Node features X: VMEM-resident (constant block index).
                pl.BlockSpec((n_pad, d), lambda l, r: (0, 0)),
                # Per-layer conv weight / BN gamma / BN beta.
                pl.BlockSpec((1, d, d), lambda l, r: (l, 0, 0)),
                pl.BlockSpec((1, 1, d), lambda l, r: (l, 0, 0)),
                pl.BlockSpec((1, 1, d), lambda l, r: (l, 0, 0)),
                # Pooling matrix and Linear head params: VMEM-resident.
                pl.BlockSpec((g_pad, n_pad), lambda l, r: (0, 0)),
                pl.BlockSpec((d, d), lambda l, r: (0, 0)),
                pl.BlockSpec((1, d), lambda l, r: (0, 0)),
            ],
            out_specs=pl.BlockSpec((g_pad, d), lambda l, r: (0, 0)),
            scratch_shapes=[
                pltpu.VMEM((n_pad, d), jnp.bfloat16),   # h_cur
                pltpu.VMEM((n_pad, d), jnp.bfloat16),   # xw
                pltpu.VMEM((n_pad, d), jnp.float32),    # h_next (pre-BN)
                pltpu.VMEM((1, d), jnp.float32),        # s_sum
                pltpu.VMEM((1, d), jnp.float32),        # s_sq
            ]),
        compiler_params=pltpu.CompilerParams(
            # Row tiles are coupled by the cross-tile BatchNorm statistics and
            # the layer->layer dependency, so both axes are sequential.
            dimension_semantics=("arbitrary", "arbitrary")),
    )(a_hat, x_p, w_stack, gamma_stack, beta_stack, p_pad, lw, lb)

    return out_pad[:num_graphs, :num_out]


def reference_forward(params, x, edge_index, batch, num_graphs):
    """Pure-JAX f32 reference of the same forward pass (for validation)."""
    n = x.shape[0]
    a = build_a_hat(edge_index, n)
    h = x
    for (w, gamma, beta) in params["layers"]:
        h = a @ (h @ w)
        mean = h.mean(axis=0, keepdims=True)
        var = ((h - mean) ** 2).mean(axis=0, keepdims=True)
        h = (h - mean) * jax.lax.rsqrt(var + BN_EPS) * gamma + beta
        h = jnp.maximum(h, 0.0)
    p = build_mean_pool_matrix(batch, num_graphs)
    return p @ h @ params["lin_w"] + params["lin_b"]


# --------------------------------- main --------------------------------------

if __name__ == "__main__":
    NUM_NODE_FEATURES = 32
    HIDDEN_CHANNELS = 32
    NUM_OUT_FEATURES = 32
    NUM_MESSAGE_PASSES = 3

    NUM_GRAPHS = 2
    NODES_PER_GRAPH = 32
    N = NUM_GRAPHS * NODES_PER_GRAPH
    EDGES_PER_GRAPH = 100

    key = jax.random.PRNGKey(0)
    key, kx, ke0, ke1 = jax.random.split(key, 4)

    x = jax.random.normal(kx, (N, NUM_NODE_FEATURES), jnp.float32)

    # Random undirected edges within each graph.
    src_dst = []
    for g, kg in enumerate((ke0, ke1)):
        k_s, k_d = jax.random.split(kg)
        s = jax.random.randint(k_s, (EDGES_PER_GRAPH,), 0, NODES_PER_GRAPH,
                               dtype=jnp.int32) + g * NODES_PER_GRAPH
        t = jax.random.randint(k_d, (EDGES_PER_GRAPH,), 0, NODES_PER_GRAPH,
                               dtype=jnp.int32) + g * NODES_PER_GRAPH
        src_dst.append((s, t))
        src_dst.append((t, s))  # symmetric
    src = jnp.concatenate([sd[0] for sd in src_dst])
    dst = jnp.concatenate([sd[1] for sd in src_dst])
    edge_index = jnp.stack([src, dst], axis=0)              # [2, 400]

    batch = jnp.repeat(jnp.arange(NUM_GRAPHS, dtype=jnp.int32), NODES_PER_GRAPH)

    params = init_params(jax.random.PRNGKey(42), NUM_NODE_FEATURES,
                         HIDDEN_CHANNELS, NUM_OUT_FEATURES, NUM_MESSAGE_PASSES)

    # tm=32 -> 2 row tiles: exercises the cross-tile BatchNorm accumulation.
    out = gcn_conv_model_forward(params, x, edge_index, batch, NUM_GRAPHS, tm=32)
    out = jax.block_until_ready(out)

    assert out.shape == (NUM_GRAPHS, NUM_OUT_FEATURES), out.shape
    assert jnp.all(jnp.isfinite(out))

    # Validate against the pure-JAX f32 reference (bf16 matmul operands ->
    # loose tolerance; catches any tiling / BN-stat bugs).
    ref = reference_forward(params, x, edge_index, batch, NUM_GRAPHS)
    assert jnp.allclose(out, ref, rtol=2e-1, atol=2e-1), \
        float(jnp.max(jnp.abs(out - ref)))

    print("KERNEL_OK")
</pallas_src>

<mosaic_0001>
module attributes {stable_mosaic.version = 11 : i64} {
  func.func private @main(%arg0: i32) attributes {dimension_semantics = [#tpu.dimension_semantics<core_parallel>], iteration_bounds = array<i64: 2>, tpu.core_type = #tpu.core_type<sc_scalar_subcore>, window_params = []} {
    return
  }
}

module attributes {stable_mosaic.version = 11 : i64} {
  func.func private @main(%arg0: i32) attributes {dimension_semantics = [#tpu.dimension_semantics<core_parallel>], iteration_bounds = array<i64: 2>, tpu.core_type = #tpu.core_type<sc_scalar_subcore>, window_params = []} {
    return
  }
}

module attributes {stable_mosaic.version = 11 : i64} {
  func.func @fused_gcn_kernel(%arg0: i32, %arg1: i32, %arg2: memref<32x64xbf16, #tpu.memory_space<vmem>>, %arg3: memref<64x128xbf16, #tpu.memory_space<vmem>>, %arg4: memref<1x128x128xbf16, #tpu.memory_space<vmem>>, %arg5: memref<1x1x128xf32, #tpu.memory_space<vmem>>, %arg6: memref<1x1x128xf32, #tpu.memory_space<vmem>>, %arg7: memref<8x64xbf16, #tpu.memory_space<vmem>>, %arg8: memref<128x128xbf16, #tpu.memory_space<vmem>>, %arg9: memref<1x128xf32, #tpu.memory_space<vmem>>, %arg10: memref<8x128xf32, #tpu.memory_space<vmem>>, %arg11: memref<64x128xbf16, #tpu.memory_space<vmem>>, %arg12: memref<64x128xbf16, #tpu.memory_space<vmem>>, %arg13: memref<64x128xf32, #tpu.memory_space<vmem>>, %arg14: memref<1x128xf32, #tpu.memory_space<vmem>>, %arg15: memref<1x128xf32, #tpu.memory_space<vmem>>) attributes {dimension_semantics = [#tpu.dimension_semantics<arbitrary>, #tpu.dimension_semantics<arbitrary>], iteration_bounds = array<i64: 3, 2>, scalar_prefetch = 0 : i64, scratch_operands = 5 : i64, tpu.core_type = #tpu.core_type<tc>, window_params = [{transform_indices = @transform_0, window_bounds = array<i64: 32, 64>}, {pipeline_mode = #tpu.pipeline_mode<synchronous>, transform_indices = @transform_1, window_bounds = array<i64: 64, 128>}, {transform_indices = @transform_2, window_bounds = array<i64: 1, 128, 128>}, {transform_indices = @transform_3, window_bounds = array<i64: 1, 1, 128>}, {transform_indices = @transform_4, window_bounds = array<i64: 1, 1, 128>}, {pipeline_mode = #tpu.pipeline_mode<synchronous>, transform_indices = @transform_5, window_bounds = array<i64: 8, 64>}, {pipeline_mode = #tpu.pipeline_mode<synchronous>, transform_indices = @transform_6, window_bounds = array<i64: 128, 128>}, {pipeline_mode = #tpu.pipeline_mode<synchronous>, transform_indices = @transform_7, window_bounds = array<i64: 1, 128>}, {pipeline_mode = #tpu.pipeline_mode<synchronous>, transform_indices = @transform_8, window_bounds = array<i64: 8, 128>}]} {
    %c0_i32 = arith.constant 0 : i32
    %0 = arith.cmpi eq, %arg0, %c0_i32 : i32
    %c0_i32_0 = arith.constant 0 : i32
    %1 = arith.cmpi eq, %arg1, %c0_i32_0 : i32
    %2 = arith.andi %0, %1 : i1
    %3 = arith.extui %2 : i1 to i32
    %c0_i32_1 = arith.constant 0 : i32
    %4 = arith.cmpi ne, %3, %c0_i32_1 : i32
    scf.if %4 {
      %c0_21 = arith.constant 0 : index
      %c0_22 = arith.constant 0 : index
      %34 = vector.load %arg3[%c0_21, %c0_22] : memref<64x128xbf16, #tpu.memory_space<vmem>>, vector<64x128xbf16>
      %c0_23 = arith.constant 0 : index
      %c0_24 = arith.constant 0 : index
      %35 = vector.load %arg11[%c0_23, %c0_24] : memref<64x128xbf16, #tpu.memory_space<vmem>>, vector<64x128xbf16>
      tpu.vector_store %arg11[%c0_23, %c0_24], %34 {strides = array<i32>} : memref<64x128xbf16, #tpu.memory_space<vmem>>, vector<64x128xbf16>,
    } else {
    }
    %c0_i32_2 = arith.constant 0 : i32
    %5 = arith.cmpi eq, %arg1, %c0_i32_2 : i32
    %6 = arith.extui %5 : i1 to i32
    %c0_i32_3 = arith.constant 0 : i32
    %7 = arith.cmpi ne, %6, %c0_i32_3 : i32
    scf.if %7 {
      %c0_21 = arith.constant 0 : index
      %c0_22 = arith.constant 0 : index
      %34 = vector.load %arg11[%c0_21, %c0_22] : memref<64x128xbf16, #tpu.memory_space<vmem>>, vector<64x128xbf16>
      %c0_23 = arith.constant 0 : index
      %c0_24 = arith.constant 0 : index
      %c0_25 = arith.constant 0 : index
      %35 = vector.load %arg4[%c0_23, %c0_24, %c0_25] : memref<1x128x128xbf16, #tpu.memory_space<vmem>>, vector<1x128x128xbf16>
      %36 = vector.shape_cast %35 : vector<1x128x128xbf16> to vector<128x128xbf16>
      %cst_26 = arith.constant dense<0.000000e+00> : vector<64x128xf32>
      %37 = tpu.matmul %34, %36, %cst_26 {dimension_numbers = #tpu.dot_dimension_numbers<[1], [0], [0], [1], [0, 0, 1, 1], [], []>} : vector<64x128xbf16>, vector<128x128xbf16>, vector<64x128xf32> -> vector<64x128xf32>
      %38 = arith.truncf %37 : vector<64x128xf32> to vector<64x128xbf16>
      %c0_27 = arith.constant 0 : index
      %c0_28 = arith.constant 0 : index
      %39 = vector.load %arg12[%c0_27, %c0_28] : memref<64x128xbf16, #tpu.memory_space<vmem>>, vector<64x128xbf16>
      tpu.vector_store %arg12[%c0_27, %c0_28], %38 {strides = array<i32>} : memref<64x128xbf16, #tpu.memory_space<vmem>>, vector<64x128xbf16>,
      %cst_29 = arith.constant 0.000000e+00 : f32
      %40 = vector.broadcast %cst_29 : f32 to vector<1x128xf32>
      %c0_30 = arith.constant 0 : index
      %c0_31 = arith.constant 0 : index
      %41 = vector.load %arg14[%c0_30, %c0_31] : memref<1x128xf32, #tpu.memory_space<vmem>>, vector<1x128xf32>
      tpu.vector_store %arg14[%c0_30, %c0_31], %40 {strides = array<i32>} : memref<1x128xf32, #tpu.memory_space<vmem>>, vector<1x128xf32>,
      %cst_32 = arith.constant 0.000000e+00 : f32
      %42 = vector.broadcast %cst_32 : f32 to vector<1x128xf32>
      %c0_33 = arith.constant 0 : index
      %c0_34 = arith.constant 0 : index
      %43 = vector.load %arg15[%c0_33, %c0_34] : memref<1x128xf32, #tpu.memory_space<vmem>>, vector<1x128xf32>
      tpu.vector_store %arg15[%c0_33, %c0_34], %42 {strides = array<i32>} : memref<1x128xf32, #tpu.memory_space<vmem>>, vector<1x128xf32>,
    } else {
    }
    %c0 = arith.constant 0 : index
    %c0_4 = arith.constant 0 : index
    %8 = vector.load %arg2[%c0, %c0_4] : memref<32x64xbf16, #tpu.memory_space<vmem>>, vector<32x64xbf16>
    %c0_5 = arith.constant 0 : index
    %c0_6 = arith.constant 0 : index
    %9 = vector.load %arg12[%c0_5, %c0_6] : memref<64x128xbf16, #tpu.memory_space<vmem>>, vector<64x128xbf16>
    %cst = arith.constant dense<0.000000e+00> : vector<32x128xf32>
    %10 = tpu.matmul %8, %9, %cst {dimension_numbers = #tpu.dot_dimension_numbers<[1], [0], [0], [1], [0, 0, 1, 1], [], []>} : vector<32x64xbf16>, vector<64x128xbf16>, vector<32x128xf32> -> vector<32x128xf32>
    %c32_i32 = arith.constant 32 : i32
    %11 = arith.muli %arg1, %c32_i32 : i32
    %12 = tpu.assume_multiple %11, 32 : i32
    %13 = arith.index_cast %12 : i32 to index
    %c0_7 = arith.constant 0 : index
    %14 = vector.load %arg13[%13, %c0_7] : memref<64x128xf32, #tpu.memory_space<vmem>>, vector<32x128xf32>
    tpu.vector_store %arg13[%13, %c0_7], %10 {strides = array<i32>} : memref<64x128xf32, #tpu.memory_space<vmem>>, vector<32x128xf32>,
    %c0_8 = arith.constant 0 : index
    %c0_9 = arith.constant 0 : index
    %15 = vector.load %arg14[%c0_8, %c0_9] : memref<1x128xf32, #tpu.memory_space<vmem>>, vector<1x128xf32>
    %cst_10 = arith.constant dense<0.000000e+00> : vector<128xf32>
    %16 = vector.multi_reduction <add>, %10, %cst_10 [0] : vector<32x128xf32> to vector<128xf32>
    %17 = vector.shape_cast %16 : vector<128xf32> to vector<1x128xf32>
    %18 = arith.addf %15, %17 : vector<1x128xf32>
    %c0_11 = arith.constant 0 : index
    %c0_12 = arith.constant 0 : index
    %19 = vector.load %arg14[%c0_11, %c0_12] : memref<1x128xf32, #tpu.memory_space<vmem>>, vector<1x128xf32>
    tpu.vector_store %arg14[%c0_11, %c0_12], %18 {strides = array<i32>} : memref<1x128xf32, #tpu.memory_space<vmem>>, vector<1x128xf32>,
    %c0_13 = arith.constant 0 : index
    %c0_14 = arith.constant 0 : index
    %20 = vector.load %arg15[%c0_13, %c0_14] : memref<1x128xf32, #tpu.memory_space<vmem>>, vector<1x128xf32>
    %21 = arith.mulf %10, %10 : vector<32x128xf32>
    %cst_15 = arith.constant dense<0.000000e+00> : vector<128xf32>
    %22 = vector.multi_reduction <add>, %21, %cst_15 [0] : vector<32x128xf32> to vector<128xf32>
    %23 = vector.shape_cast %22 : vector<128xf32> to vector<1x128xf32>
    %24 = arith.addf %20, %23 : vector<1x128xf32>
    %c0_16 = arith.constant 0 : index
    %c0_17 = arith.constant 0 : index
    %25 = vector.load %arg15[%c0_16, %c0_17] : memref<1x128xf32, #tpu.memory_space<vmem>>, vector<1x128xf32>
    tpu.vector_store %arg15[%c0_16, %c0_17], %24 {strides = array<i32>} : memref<1x128xf32, #tpu.memory_space<vmem>>, vector<1x128xf32>,
    %c1_i32 = arith.constant 1 : i32
    %26 = arith.cmpi eq, %arg1, %c1_i32 : i32
    %27 = arith.extui %26 : i1 to i32
    %c0_i32_18 = arith.constant 0 : i32
    %28 = arith.cmpi ne, %27, %c0_i32_18 : i32
    scf.if %28 {
      %c0_21 = arith.constant 0 : index
      %c0_22 = arith.constant 0 : index
      %34 = vector.load %arg14[%c0_21, %c0_22] : memref<1x128xf32, #tpu.memory_space<vmem>>, vector<1x128xf32>
      %cst_23 = arith.constant 1.562500e-02 : f32
      %35 = vector.broadcast %cst_23 : f32 to vector<1x128xf32>
      %36 = arith.mulf %34, %35 : vector<1x128xf32>
      %c0_24 = arith.constant 0 : index
      %c0_25 = arith.constant 0 : index
      %37 = vector.load %arg15[%c0_24, %c0_25] : memref<1x128xf32, #tpu.memory_space<vmem>>, vector<1x128xf32>
      %cst_26 = arith.constant 1.562500e-02 : f32
      %38 = vector.broadcast %cst_26 : f32 to vector<1x128xf32>
      %39 = arith.mulf %37, %38 : vector<1x128xf32>
      %40 = arith.mulf %36, %36 : vector<1x128xf32>
      %41 = arith.subf %39, %40 : vector<1x128xf32>
      %cst_27 = arith.constant 0.000000e+00 : f32
      %42 = vector.broadcast %cst_27 : f32 to vector<1x128xf32>
      %43 = arith.maximumf %41, %42 : vector<1x128xf32>
      %c0_28 = arith.constant 0 : index
      %c0_29 = arith.constant 0 : index
      %c0_30 = arith.constant 0 : index
      %44 = vector.load %arg5[%c0_28, %c0_29, %c0_30] : memref<1x1x128xf32, #tpu.memory_space<vmem>>, vector<1x1x128xf32>
      %45 = vector.shape_cast %44 : vector<1x1x128xf32> to vector<1x128xf32>
      %cst_31 = arith.constant 9.99999974E-6 : f32
      %46 = vector.broadcast %cst_31 : f32 to vector<1x128xf32>
      %47 = arith.addf %43, %46 : vector<1x128xf32>
      %48 = math.rsqrt %47 : vector<1x128xf32>
      %49 = arith.mulf %45, %48 : vector<1x128xf32>
      %c0_32 = arith.constant 0 : index
      %c0_33 = arith.constant 0 : index
      %c0_34 = arith.constant 0 : index
      %50 = vector.load %arg6[%c0_32, %c0_33, %c0_34] : memref<1x1x128xf32, #tpu.memory_space<vmem>>, vector<1x1x128xf32>
      %51 = vector.shape_cast %50 : vector<1x1x128xf32> to vector<1x128xf32>
      %52 = arith.mulf %36, %49 : vector<1x128xf32>
      %53 = arith.subf %51, %52 : vector<1x128xf32>
      %c0_35 = arith.constant 0 : index
      %c0_36 = arith.constant 0 : index
      %54 = vector.load %arg13[%c0_35, %c0_36] : memref<64x128xf32, #tpu.memory_space<vmem>>, vector<64x128xf32>
      %55 = vector.broadcast %49 : vector<1x128xf32> to vector<64x128xf32>
      %56 = arith.mulf %54, %55 : vector<64x128xf32>
      %57 = vector.broadcast %53 : vector<1x128xf32> to vector<64x128xf32>
      %58 = arith.addf %56, %57 : vector<64x128xf32>
      %cst_37 = arith.constant 0.000000e+00 : f32
      %59 = vector.broadcast %cst_37 : f32 to vector<64x128xf32>
      %60 = arith.maximumf %58, %59 : vector<64x128xf32>
      %61 = arith.truncf %60 : vector<64x128xf32> to vector<64x128xbf16>
      %c0_38 = arith.constant 0 : index
      %c0_39 = arith.constant 0 : index
      %62 = vector.load %arg11[%c0_38, %c0_39] : memref<64x128xbf16, #tpu.memory_space<vmem>>, vector<64x128xbf16>
      tpu.vector_store %arg11[%c0_38, %c0_39], %61 {strides = array<i32>} : memref<64x128xbf16, #tpu.memory_space<vmem>>, vector<64x128xbf16>,
    } else {
    }
    %c2_i32 = arith.constant 2 : i32
    %29 = arith.cmpi eq, %arg0, %c2_i32 : i32
    %c1_i32_19 = arith.constant 1 : i32
    %30 = arith.cmpi eq, %arg1, %c1_i32_19 : i32
    %31 = arith.andi %29, %30 : i1
    %32 = arith.extui %31 : i1 to i32
    %c0_i32_20 = arith.constant 0 : i32
    %33 = arith.cmpi ne, %32, %c0_i32_20 : i32
    scf.if %33 {
      %c0_21 = arith.constant 0 : index
      %c0_22 = arith.constant 0 : index
      %34 = vector.load %arg7[%c0_21, %c0_22] : memref<8x64xbf16, #tpu.memory_space<vmem>>, vector<8x64xbf16>
      %c0_23 = arith.constant 0 : index
      %c0_24 = arith.constant 0 : index
      %35 = vector.load %arg11[%c0_23, %c0_24] : memref<64x128xbf16, #tpu.memory_space<vmem>>, vector<64x128xbf16>
      %cst_25 = arith.constant dense<0.000000e+00> : vector<8x128xf32>
      %36 = tpu.matmul %34, %35, %cst_25 {dimension_numbers = #tpu.dot_dimension_numbers<[1], [0], [0], [1], [0, 0, 1, 1], [], []>} : vector<8x64xbf16>, vector<64x128xbf16>, vector<8x128xf32> -> vector<8x128xf32>
      %37 = arith.truncf %36 : vector<8x128xf32> to vector<8x128xbf16>
      %c0_26 = arith.constant 0 : index
      %c0_27 = arith.constant 0 : index
      %38 = vector.load %arg8[%c0_26, %c0_27] : memref<128x128xbf16, #tpu.memory_space<vmem>>, vector<128x128xbf16>
      %cst_28 = arith.constant dense<0.000000e+00> : vector<8x128xf32>
      %39 = tpu.matmul %37, %38, %cst_28 {dimension_numbers = #tpu.dot_dimension_numbers<[1], [0], [0], [1], [0, 0, 1, 1], [], []>} : vector<8x128xbf16>, vector<128x128xbf16>, vector<8x128xf32> -> vector<8x128xf32>
      %c0_29 = arith.constant 0 : index
      %c0_30 = arith.constant 0 : index
      %40 = vector.load %arg9[%c0_29, %c0_30] : memref<1x128xf32, #tpu.memory_space<vmem>>, vector<1x128xf32>
      %41 = vector.broadcast %40 : vector<1x128xf32> to vector<8x128xf32>
      %42 = arith.addf %39, %41 : vector<8x128xf32>
      %c0_31 = arith.constant 0 : index
      %c0_32 = arith.constant 0 : index
      %43 = vector.load %arg10[%c0_31, %c0_32] : memref<8x128xf32, #tpu.memory_space<vmem>>, vector<8x128xf32>
      tpu.vector_store %arg10[%c0_31, %c0_32], %42 {strides = array<i32>} : memref<8x128xf32, #tpu.memory_space<vmem>>, vector<8x128xf32>,
    } else {
    }
    return
  }
  func.func @transform_0(%arg0: i32, %arg1: i32) -> (i32, i32) {
    %c0_i32 = arith.constant 0 : i32
    %c0_i32_0 = arith.constant 0 : i32
    return %arg1, %c0_i32 : i32, i32
  }
  func.func @transform_1(%arg0: i32, %arg1: i32) -> (i32, i32) {
    %c0_i32 = arith.constant 0 : i32
    %c0_i32_0 = arith.constant 0 : i32
    %c0_i32_1 = arith.constant 0 : i32
    return %c0_i32, %c0_i32_0 : i32, i32
  }
  func.func @transform_2(%arg0: i32, %arg1: i32) -> (i32, i32, i32) {
    %c0_i32 = arith.constant 0 : i32
    %c0_i32_0 = arith.constant 0 : i32
    %c0_i32_1 = arith.constant 0 : i32
    return %arg0, %c0_i32, %c0_i32_0 : i32, i32, i32
  }
  func.func @transform_3(%arg0: i32, %arg1: i32) -> (i32, i32, i32) {
    %c0_i32 = arith.constant 0 : i32
    %c0_i32_0 = arith.constant 0 : i32
    %c0_i32_1 = arith.constant 0 : i32
    return %arg0, %c0_i32, %c0_i32_0 : i32, i32, i32
  }
  func.func @transform_4(%arg0: i32, %arg1: i32) -> (i32, i32, i32) {
    %c0_i32 = arith.constant 0 : i32
    %c0_i32_0 = arith.constant 0 : i32
    %c0_i32_1 = arith.constant 0 : i32
    return %arg0, %c0_i32, %c0_i32_0 : i32, i32, i32
  }
  func.func @transform_5(%arg0: i32, %arg1: i32) -> (i32, i32) {
    %c0_i32 = arith.constant 0 : i32
    %c0_i32_0 = arith.constant 0 : i32
    %c0_i32_1 = arith.constant 0 : i32
    return %c0_i32, %c0_i32_0 : i32, i32
  }
  func.func @transform_6(%arg0: i32, %arg1: i32) -> (i32, i32) {
    %c0_i32 = arith.constant 0 : i32
    %c0_i32_0 = arith.constant 0 : i32
    %c0_i32_1 = arith.constant 0 : i32
    return %c0_i32, %c0_i32_0 : i32, i32
  }
  func.func @transform_7(%arg0: i32, %arg1: i32) -> (i32, i32) {
    %c0_i32 = arith.constant 0 : i32
    %c0_i32_0 = arith.constant 0 : i32
    %c0_i32_1 = arith.constant 0 : i32
    return %c0_i32, %c0_i32_0 : i32, i32
  }
  func.func @transform_8(%arg0: i32, %arg1: i32) -> (i32, i32) {
    %c0_i32 = arith.constant 0 : i32
    %c0_i32_0 = arith.constant 0 : i32
    %c0_i32_1 = arith.constant 0 : i32
    return %c0_i32, %c0_i32_0 : i32, i32
  }
}

</mosaic_0001>

<bundles_post_ra>
// kernel: gcn_conv_model_forward.1
= control target key start
LH: loop header
LB: loop body
LE: loop exit
PB: predicated region body
PF: predicated region fallthrough
CT: control target
= control target key end

     0   :  { %s1268_s27 = smov 0   ;;  %s1270_s28 = smov 0   ;;  %s1418_s0 = inlined_call_operand.vmem [shape: bf16[64,64], index: 0, kind: input, shape index: {}]   ;;  %s1419_s1 = inlined_call_operand.vmem [shape: bf16[64,128], index: 1, kind: input, shape index: {}]   ;;  %s1420_s2 = inlined_call_operand.vmem [shape: bf16[3,128,128], index: 2, kind: input, shape index: {}]   ;;  %s1421_s3 = inlined_call_operand.vmem [shape: f32[3,1,128], index: 3, kind: input, shape index: {}]   ;;  %s1422_s4 = inlined_call_operand.vmem [shape: f32[3,1,128], index: 4, kind: input, shape index: {}]   ;;  %s1423_s5 = inlined_call_operand.vmem [shape: bf16[8,64], index: 5, kind: input, shape index: {}]   ;;  %s1424_s6 = inlined_call_operand.vmem [shape: bf16[128,128], index: 6, kind: input, shape index: {}]   ;;  %s1425_s7 = inlined_call_operand.vmem [shape: f32[1,128], index: 7, kind: input, shape index: {}]   ;;  %s1426_s8 = inlined_call_operand.vmem [shape: f32[8,128], index: 8, kind: output, shape index: {}]  }
   0x1   :  { %s1272_s29 = smov 0   ;;  %s1274_s30 = smov 0  }
   0x2   :  { %s1276_s9 = smov 0  }
   0x3 LB: > { %s27_s10 = sadd.s32 1, %s1210_s29  ;;  %s30_s11 = sadd.s32 1, %s1214_s30  ;;  %s1218_s9 = sphi %s1276_s9, %s18_s9   ;;  %s1214_s30 = sphi %s1274_s30, %s1432_s30   ;;  %s1210_s29 = sphi %s1272_s29, %s1431_s29   ;;  %s1206_s28 = sphi %s1270_s28, %s1430_s28   ;;  %s1202_s27 = sphi %s1268_s27, %s1429_s27  }
   0x4   : > { %p28_p0 = scmp.ge.s32.totalorder %s27_s10, 2  ;;  %p960_p1 = scmp.ge.s32.totalorder %s1218_s9, 1 }
   0x5   : > { %p296_p2 = scmp.lt.s32.totalorder %s1218_s9, 7 }
   0x6   : > { %s1434_s10 = smov (%p28_p0, %s27_s10), 0  ;;  %s1436_s11 = smov (!%p28_p0, %s30_s11), %s1214_s30 }
   0x7   : > { %p297_p3 = pnand %p960_p1, %p296_p2  ;;  %p32_p4 = scmp.ge.s32.totalorder %s1436_s11, 3 }
   0x8   : > { %s961_s12 = sshll.u32 (!%p297_p3), %s1202_s27, 2  ;;  %p342_p5 = scmp.lt.s32.totalorder (!%p297_p3), %s1206_s28, 2 }
   0x9   : > { %s1438_s11 = smov (%p32_p4, %s1436_s11), 0  ;;  %300 = sbr.rel (%p297_p3) target bundleno = 1029 (0x405), region = 52 }
   0xa   : > { %1427 = sst [smem:[#allocation7_spill]] %s1438_s11  ;;  %p337_p6 = scmp.lt.s32.totalorder (!%p297_p3), %s961_s12, 7 }
   0xb   : > { %p354_p7 = scmp.eq.s32.totalorder (!%p297_p3), %s1206_s28, 0  ;;  %p355_p8 = scmp.eq.s32.totalorder (!%p297_p3), %s1202_s27, 0 }
   0xd   : > { %p356_p9 = pnand (!%p297_p3), %p355_p8, %p354_p7 }
  0x10   : > { %s1306_s13 = scalar_select %p342_p5, %s1206_s28, 2 }
  0x11   : > { %s1440_s12 = smov (!%p337_p6, %s961_s12), 7  ;;  %359 = sbr.rel (%p356_p9) target bundleno = 24 (0x18), region = 56 }
  0x12   : > { %s996_s14 = sshll.u32 %s1306_s13, 6  ;;  %s349_s17 = scalar_lea.vmem %s1421_s3, %s1306_s13  ;;  %v1156_v0 = vld [vmem:[%s1419_s1] sm:$0xff] (!%p356_p9)   ;;  %v1157_v1 = vld [vmem:[%s1419_s1 + $0x8] sm:$0xff] (!%p356_p9)   ;;  %v1158_v2 = vld [vmem:[%s1419_s1 + $0x10] sm:$0xff] (!%p356_p9)  }
  0x13   : > { %s962_s18 = sshll.u32 %s1440_s12, 2  ;;  %s1316_s21 = scalar_lea.vmem %s1420_s2, %s996_s14  ;;  %392 = vst [vmem:[#allocation2] sm:$0xff] (!%p356_p9), %v1156_v0  ;;  %393 = vst [vmem:[#allocation2 + $0x8] sm:$0xff] (!%p356_p9), %v1157_v1  ;;  %v1159_v3 = vld [vmem:[%s1419_s1 + $0x18] sm:$0xff] (!%p356_p9)  }
  0x14   : > { %s1321_s24 = scalar_lea.vmem %s1418_s0, %s962_s18  ;;  %s352_s11 = scalar_lea.vmem %s1422_s4, %s1306_s13  ;;  %394 = vst [vmem:[#allocation2 + $0x10] sm:$0xff] (!%p356_p9), %v1158_v2  ;;  %395 = vst [vmem:[#allocation2 + $0x18] sm:$0xff] (!%p356_p9), %v1159_v3 }
  0x18 PF: > { %p969_p10 = scmp.ne.s32.totalorder %s1202_s27, 0 }
  0x19   : > { %v1160_v4 = vld [vmem:[%s1316_s21] sm:$0xff] (!%p969_p10)   ;;  %v1161_v5 = vld [vmem:[%s1316_s21 + $0x8] sm:$0xff] (!%p969_p10)   ;;  %v1162_v6 = vld [vmem:[%s1316_s21 + $0x10] sm:$0xff] (!%p969_p10)   ;;  %v1220_v16 = vmov (!%p969_p10), 0.0  }
  0x1a   : > { %398 = sbr.rel (%p969_p10) target bundleno = 276 (0x114), region = 60  ;;  %1029 = vmatprep.subr.bf16.mxu0 (!%p969_p10), %v1160_v4  ;;  %1097 = vmatprep.subr.bf16.mxu1 (!%p969_p10), %v1160_v4  ;;  %v1163_v7 = vld [vmem:[%s1316_s21 + $0x18] sm:$0xff] (!%p969_p10)   ;;  %v399_v8 = vld [vmem:[#allocation2] sm:$0xff] (!%p969_p10)  ;;  %v1165_v11 = vld [vmem:[%s1316_s21 + $0x28] sm:$0xff] (!%p969_p10)   ;;  %540 = vst [vmem:[#allocation5] sm:$0x1] (!%p969_p10), %v1220_v16 }
  0x1b   : > { %1030 = vmatpush3.bf16.msra.mxu0 (!%p969_p10), %v1160_v4  ;;  %1105 = vmatpush3.bf16.msra.mxu1 (!%p969_p10), %v1160_v4  ;;  %v401_v9 = vld [vmem:[#allocation2 + $0x10] sm:$0xff] (!%p969_p10)  ;;  %v1164_v10 = vld [vmem:[%s1316_s21 + $0x20] sm:$0xff] (!%p969_p10)   ;;  %v1167_v13 = vld [vmem:[%s1316_s21 + $0x38] sm:$0xff] (!%p969_p10)   ;;  %541 = vst [vmem:[#allocation6] sm:$0x1] (!%p969_p10), %v1220_v16 }
  0x1c   : > { %1031 = vmatprep.subr.bf16.mxu0 (!%p969_p10), %v1161_v5  ;;  %1098 = vmatprep.subr.bf16.mxu1 (!%p969_p10), %v1161_v5  ;;  %v1166_v12 = vld [vmem:[%s1316_s21 + $0x30] sm:$0xff] (!%p969_p10)   ;;  %v400_v14 = vld [vmem:[#allocation2 + $0x8] sm:$0xff] (!%p969_p10)  ;;  %v402_v15 = vld [vmem:[#allocation2 + $0x18] sm:$0xff] (!%p969_p10) }
  0x1d   : > { %1045 = vmatprep.mubr.bf16.mxu0 (!%p969_p10), %v399_v8  ;;  %1049 = vmatprep.mubr.bf16.mxu1 (!%p969_p10), %v401_v9 }
  0x1f   : > { %1032 = vmatpush3.bf16.msra.mxu0 (!%p969_p10), %v1161_v5  ;;  %1106 = vmatpush3.bf16.msra.mxu1 (!%p969_p10), %v1161_v5 }
  0x20   : > { %1033 = vmatprep.subr.bf16.mxu0 (!%p969_p10), %v1162_v6  ;;  %1099 = vmatprep.subr.bf16.mxu1 (!%p969_p10), %v1162_v6 }
  0x23   : > { %1034 = vmatpush3.bf16.msra.mxu0 %v1162_v6  ;;  %1107 = vmatpush3.bf16.msra.mxu1 %v1162_v6 }
  0x24   : > { %1035 = vmatprep.subr.bf16.mxu0 %v1163_v7  ;;  %1100 = vmatprep.subr.bf16.mxu1 %v1163_v7 }
  0x27   : > { %1036 = vmatpush3.bf16.msra.mxu0 %v1163_v7  ;;  %1108 = vmatpush3.bf16.msra.mxu1 %v1163_v7 }
  0x28   : > { %1037 = vmatprep.subr.bf16.mxu0 %v1164_v10  ;;  %1101 = vmatprep.subr.bf16.mxu1 %v1164_v10 }
  0x2b   : > { %1038 = vmatpush3.bf16.msra.mxu0 %v1164_v10  ;;  %1109 = vmatpush3.bf16.msra.mxu1 %v1164_v10 }
  0x2c   : > { %1039 = vmatprep.subr.bf16.mxu0 %v1165_v11  ;;  %1102 = vmatprep.subr.bf16.mxu1 %v1165_v11 }
  0x2f   : > { %1040 = vmatpush3.bf16.msra.mxu0 %v1165_v11  ;;  %1110 = vmatpush3.bf16.msra.mxu1 %v1165_v11 }
  0x30   : > { %1041 = vmatprep.subr.bf16.mxu0 %v1166_v12  ;;  %1103 = vmatprep.subr.bf16.mxu1 %v1166_v12 }
  0x33   : > { %1042 = vmatpush3.bf16.msra.mxu0 %v1166_v12  ;;  %1111 = vmatpush3.bf16.msra.mxu1 %v1166_v12 }
  0x34   : > { %1043 = vmatprep.subr.bf16.mxu0 %v1167_v13  ;;  %1104 = vmatprep.subr.bf16.mxu1 %v1167_v13 }
  0x37   : > { %1044 = vmatpush3.bf16.msra.mxu0 %v1167_v13  ;;  %1112 = vmatpush3.bf16.msra.mxu1 %v1167_v13 }
  0x3a   : > { %1046 = vmatmul.mubr.bf16.vlgmr.msra.gmra.mrb[0].mxu0 %v400_v14  ;;  %1050 = vmatmul.mubr.bf16.vlgmr.msra.gmra.mrb[0].mxu1 %v402_v15 }
 0x10d   : > { %v1047_v17 = vpop.f32.mrb[0].mxu0  ;;  %v1051_v18 = vpop.f32.mrb[0].mxu1 }
 0x10e   : > { %v501_v19 = vpop.f32.mrb[1].mxu0  ;;  %v517_v20 = vpop.f32.mrb[1].mxu1 }
 0x10f   : > { %v1048_v21 = vpop.f32.mrb[2].mxu0  ;;  %v1052_v22 = vpop.f32.mrb[2].mxu1 }
 0x110   : > { %v533_v23 = vpack.c.bf16 %v1048_v21, %v1047_v17  ;;  %v535_v24 = vpack.c.bf16 %v1052_v22, %v1051_v18  ;;  %v504_v25 = vpop.f32.mrb[3].mxu0  ;;  %v520_v26 = vpop.f32.mrb[3].mxu1 }
 0x111   : > { %v532_v27 = vpack.c.bf16 %v504_v25, %v501_v19  ;;  %v534_v28 = vpack.c.bf16 %v520_v26, %v517_v20 }
 0x112   : > { %537 = vst [vmem:[#allocation3 + $0x8] sm:$0xff] %v533_v23  ;;  %539 = vst [vmem:[#allocation3 + $0x18] sm:$0xff] %v535_v24 }
 0x113   : > { %536 = vst [vmem:[#allocation3] sm:$0xff] %v532_v27  ;;  %538 = vst [vmem:[#allocation3 + $0x10] sm:$0xff] %v534_v28 }
 0x114 PF: > { %vm560_vm0 = vcmask 523264   ;;  %v1168_v31 = vld [vmem:[%s1321_s24] sm:$0xff]   ;;  %v1169_v34 = vld [vmem:[%s1321_s24 + $0x8] sm:$0xff]   ;;  %p650_p11 = scmp.eq.s32.totalorder %s1202_s27, 1  ;;  %s982_s21 = sshll.u32 %s1202_s27, 5 }
 0x115   : > { %1061 = vmatprep.mubr.msk.bf16.mxu0 %vm560_vm0, %v1168_v31  ;;  %s617_s23 = scalar_lea.vmem [#allocation4], %s982_s21  ;;  %v622_v58 = vld [vmem:[#allocation5] sm:$0x1]  ;;  %v634_v61 = vld [vmem:[#allocation6] sm:$0x1]  ;;  %p983_p12 = scmp.ne.s32.totalorder %s1202_s27, 1 }
 0x116   : > { %v677_v9 = vlaneseq (!%p983_p12)  ;;  %v661_v11 = vld [vmem:[%s349_s17] sm:$0x1] (!%p983_p12) }
 0x117   : > { %v665_v15 = vld [vmem:[%s352_s11] sm:$0x1] (!%p983_p12) }
 0x118   : > { %v678_v10 = vshrl.u32 (!%p983_p12), %v677_v9, 7 }
 0x119   : > { %v547_v30 = vld [vmem:[#allocation3 + $0x8] sm:$0xff]  ;;  %v549_v33 = vld [vmem:[#allocation3 + $0x18] sm:$0xff] }
 0x11a   : > { %v546_v29 = vld [vmem:[#allocation3] sm:$0xff]  ;;  %v548_v32 = vld [vmem:[#allocation3 + $0x10] sm:$0xff]  ;;  %v679_v12 = vsub.s32 (!%p983_p12), 0, %v678_v10 }
 0x11b   : > { %1053 = vmatprep.subr.bf16.mxu0 %v546_v29 }
 0x11c   : > { %1054 = vmatpush3.bf16.msra.mxu0 %v546_v29 }
 0x11d   : > { %1055 = vmatprep.subr.bf16.mxu0 %v547_v30 }
 0x120   : > { %1056 = vmatpush3.bf16.msra.mxu0 %v547_v30 }
 0x121   : > { %1057 = vmatprep.subr.bf16.mxu0 %v548_v32 }
 0x124   : > { %1058 = vmatpush3.bf16.msra.mxu0 %v548_v32 }
 0x125   : > { %1059 = vmatprep.subr.bf16.mxu0 %v549_v33 }
 0x128   : > { %1060 = vmatpush3.bf16.msra.mxu0 %v549_v33 }
 0x12b   : > { %1062 = vmatmul.mubr.msk.bf16.vlgmr.msra.gmra.mrb[0].mxu0 %vm560_vm0, %v1169_v34 }
 0x1fe   : > { %v1063_v35 = vpop.f32.mrb[0].mxu0 }
 0x1ff   : > { %620 = vst [vmem:[%s617_s23 + $0x10] sm:$0xff] %v1063_v35  ;;  %v601_v36 = vpop.f32.mrb[1].mxu0  ;;  %v637_v42 = vmul.f32 %v1063_v35, %v1063_v35 }
 0x200   : > { %618 = vst [vmem:[%s617_s23] sm:$0xff] %v601_v36  ;;  %v1064_v37 = vpop.f32.mrb[2].mxu0  ;;  %v635_v39 = vmul.f32 %v601_v36, %v601_v36 }
 0x201   : > { %621 = vst [vmem:[%s617_s23 + $0x18] sm:$0xff] %v1064_v37  ;;  %v604_v38 = vpop.f32.mrb[3].mxu0  ;;  %v638_v45 = vmul.f32 %v1064_v37, %v1064_v37 }
 0x202   : > { %619 = vst [vmem:[%s617_s23 + $0x8] sm:$0xff] %v604_v38  ;;  %v623_v40 = vadd.f32 %v604_v38, %v601_v36  ;;  %v636_v41 = vmul.f32 %v604_v38, %v604_v38 }
 0x204   : > { %v624_v43 = vadd.f32 %v1063_v35, %v623_v40  ;;  %v639_v44 = vadd.f32 %v636_v41, %v635_v39 }
 0x206   : > { %v625_v46 = vadd.f32 %v1064_v37, %v624_v43  ;;  %v640_v47 = vadd.f32 %v639_v44, %v637_v42 }
 0x208   : > { %v626_v48 = vrot.slane %v625_v46, 4  ;;  %v641_v49 = vadd.f32 %v640_v47, %v638_v45 }
 0x209   : > { %v668_v16 = vld [vmem:[#allocation4] sm:$0xff] (!%p983_p12)  ;;  %v669_v17 = vld [vmem:[#allocation4 + $0x8] sm:$0xff] (!%p983_p12)  ;;  %v670_v18 = vld [vmem:[#allocation4 + $0x10] sm:$0xff] (!%p983_p12) }
 0x20a   : > { %v627_v50 = vadd.f32 %v626_v48, %v625_v46  ;;  %v642_v51 = vrot.slane %v641_v49, 4  ;;  %v671_v19 = vld [vmem:[#allocation4 + $0x18] sm:$0xff] (!%p983_p12)  ;;  %v672_v22 = vld [vmem:[#allocation4 + $0x20] sm:$0xff] (!%p983_p12)  ;;  %v673_v23 = vld [vmem:[#allocation4 + $0x28] sm:$0xff] (!%p983_p12) }
 0x20b   : > { %v674_v24 = vld [vmem:[#allocation4 + $0x30] sm:$0xff] (!%p983_p12)  ;;  %v675_v25 = vld [vmem:[#allocation4 + $0x38] sm:$0xff] (!%p983_p12) }
 0x20c   : > { %v628_v52 = vrot.slane %v627_v50, 2  ;;  %v643_v53 = vadd.f32 %v642_v51, %v641_v49 }
 0x20e   : > { %v629_v54 = vadd.f32 %v628_v52, %v627_v50  ;;  %v644_v55 = vrot.slane %v643_v53, 2 }
 0x210   : > { %v630_v56 = vrot.slane %v629_v54, 1  ;;  %v645_v57 = vadd.f32 %v644_v55, %v643_v53 }
 0x212   : > { %v631_v59 = vadd.f32 %v630_v56, %v629_v54  ;;  %v646_v60 = vrot.slane %v645_v57, 1  ;;  %653 = sbr.rel (%p983_p12) target bundleno = 579 (0x243), region = 64 }
 0x214   : > { %v632_v62 = vadd.f32 %v631_v59, %v622_v58  ;;  %v647_v63 = vadd.f32 %v646_v60, %v645_v57 }
 0x216   : > { %633 = vst [vmem:[#allocation5] sm:$0x1] %v632_v62  ;;  %v648_v0 = vadd.f32 %v647_v63, %v634_v61 }
 0x218   : > { %649 = vst [vmem:[#allocation6] sm:$0x1] %v648_v0 }
 0x21d   : > { %v654_v1 = vld [vmem:[#allocation5] sm:$0x1] }
 0x21e   : > { %v655_v3 = vmul.f32 0.015625, %v654_v1 }
 0x21f   : > { %v656_v2 = vld [vmem:[#allocation6] sm:$0x1] }
 0x220   : > { %v657_v4 = vmul.f32 0.015625, %v656_v2  ;;  %v658_v5 = vmul.f32 %v655_v3, %v655_v3 }
 0x222   : > { %v659_v6 = vsub.f32 %v657_v4, %v658_v5 }
 0x224   : > { %v660_v7 = vmax.f32 %v659_v6, 0.0 }
 0x226   : > { %v662_v8 = vadd.f32 1e-05, %v660_v7 }
 0x228   : > { %1170 = vrsqrt.f32 %v662_v8 }
 0x232   : > { %v1171_v13 = vpop.eup %1170 }
 0x233   : > { %v664_v14 = vmul.f32 %v1171_v13, %v661_v11 }
 0x235   : > { %v666_v20 = vmul.f32 %v664_v14, %v655_v3  ;;  %v680_v21 = vrot.slane %v664_v14, %v679_v12 }
 0x237   : > { %v667_v26 = vsub.f32 %v665_v15, %v666_v20  ;;  %v682_v27 = vmul.f32 %v680_v21, %v668_v16  ;;  %v683_v28 = vmul.f32 %v680_v21, %v669_v17  ;;  %v684_v29 = vmul.f32 %v680_v21, %v670_v18 }
 0x238   : > { %v685_v30 = vmul.f32 %v680_v21, %v671_v19  ;;  %v686_v31 = vmul.f32 %v680_v21, %v672_v22  ;;  %v687_v32 = vmul.f32 %v680_v21, %v673_v23  ;;  %v688_v33 = vmul.f32 %v680_v21, %v674_v24 }
 0x239   : > { %v694_v34 = vrot.slane %v667_v26, %v679_v12  ;;  %v689_v35 = vmul.f32 %v680_v21, %v675_v25 }
 0x23b   : > { %v696_v36 = vadd.f32 %v694_v34, %v682_v27  ;;  %v697_v37 = vadd.f32 %v694_v34, %v683_v28  ;;  %v698_v38 = vadd.f32 %v694_v34, %v684_v29  ;;  %v699_v39 = vadd.f32 %v694_v34, %v685_v30 }
 0x23c   : > { %v700_v40 = vadd.f32 %v694_v34, %v686_v31  ;;  %v701_v41 = vadd.f32 %v694_v34, %v687_v32  ;;  %v702_v42 = vadd.f32 %v694_v34, %v688_v33  ;;  %v703_v43 = vadd.f32 %v694_v34, %v689_v35 }
 0x23d   : > { %v704_v44 = vmax.f32 %v696_v36, 0.0  ;;  %v705_v45 = vmax.f32 %v697_v37, 0.0  ;;  %v706_v46 = vmax.f32 %v698_v38, 0.0  ;;  %v707_v47 = vmax.f32 %v699_v39, 0.0 }
 0x23e   : > { %v708_v48 = vmax.f32 %v700_v40, 0.0  ;;  %v709_v49 = vmax.f32 %v701_v41, 0.0  ;;  %v710_v50 = vmax.f32 %v702_v42, 0.0  ;;  %v711_v51 = vmax.f32 %v703_v43, 0.0 }
 0x23f   : > { %v712_v52 = vpack.c.bf16 %v705_v45, %v704_v44  ;;  %v713_v53 = vpack.c.bf16 %v707_v47, %v706_v46 }
 0x240   : > { %v714_v54 = vpack.c.bf16 %v709_v49, %v708_v48  ;;  %v715_v55 = vpack.c.bf16 %v711_v51, %v710_v50 }
 0x241   : > { %716 = vst [vmem:[#allocation2] sm:$0xff] %v712_v52  ;;  %717 = vst [vmem:[#allocation2 + $0x8] sm:$0xff] %v713_v53 }
 0x242   : > { %718 = vst [vmem:[#allocation2 + $0x10] sm:$0xff] %v714_v54  ;;  %719 = vst [vmem:[#allocation2 + $0x18] sm:$0xff] %v715_v55 }
 0x243 PF: > { %p720_p13 = scmp.eq.s32.totalorder %s1206_s28, 2 }
 0x245   : > { %p721_p0 = pnand %p720_p13, %p650_p11 }
 0x246   : > { %v1221_v57 = vmov (!%p721_p0), 0.0   ;;  %vm1222_vm1 = vmmov (!%p721_p0), 0   ;;  %v1172_v58 = vld [vmem:[%s1424_s6] sm:$0xff] (!%p721_p0)   ;;  %v1173_v60 = vld [vmem:[%s1424_s6 + $0x8] sm:$0xff] (!%p721_p0)   ;;  %v1174_v62 = vld [vmem:[%s1424_s6 + $0x10] sm:$0xff] (!%p721_p0)  }
 0x247   : > { %724 = sbr.rel (%p721_p0) target bundleno = 1029 (0x405), region = 68  ;;  %1065 = vmatprep.subr.bf16.mxu0 (!%p721_p0), %v1221_v57  ;;  %1073 = vmatprep.mubr.msk.bf16.mxu0 (!%p721_p0), %vm1222_vm1, %v1221_v57  ;;  %v1175_v0 = vld [vmem:[%s1424_s6 + $0x18] sm:$0xff] (!%p721_p0)   ;;  %v725_v1 = vld [vmem:[%s1423_s5] sm:$0xf] (!%p721_p0)  ;;  %v1177_v3 = vld [vmem:[%s1424_s6 + $0x28] sm:$0xff] (!%p721_p0)  }
 0x248   : > { %v726_v56 = vld [vmem:[#allocation2] sm:$0xff] (!%p721_p0)  ;;  %1077 = vmatprep.subr.bf16.mxu1 (!%p721_p0), %v1221_v57  ;;  %v727_v59 = vld [vmem:[#allocation2 + $0x8] sm:$0xff] (!%p721_p0)  ;;  %1093 = vmatprep.mubr.msk.bf16.mxu1 (!%p721_p0), %vm1222_vm1, %v1221_v57  ;;  %v1178_v4 = vld [vmem:[%s1424_s6 + $0x30] sm:$0xff] (!%p721_p0)  }
 0x249   : > { %1066 = vmatpush3.bf16.msra.mxu0 (!%p721_p0), %v726_v56  ;;  %1078 = vmatpush3.bf16.msra.mxu1 (!%p721_p0), %v1172_v58  ;;  %v728_v61 = vld [vmem:[#allocation2 + $0x10] sm:$0xff] (!%p721_p0)  ;;  %v729_v63 = vld [vmem:[#allocation2 + $0x18] sm:$0xff] (!%p721_p0)  ;;  %v1176_v2 = vld [vmem:[%s1424_s6 + $0x20] sm:$0xff] (!%p721_p0)  }
 0x24a   : > { %1067 = vmatprep.subr.bf16.mxu0 (!%p721_p0), %v1221_v57  ;;  %1079 = vmatprep.subr.bf16.mxu1 (!%p721_p0), %v1221_v57  ;;  %v1179_v5 = vld [vmem:[%s1424_s6 + $0x38] sm:$0xff] (!%p721_p0)   ;;  %v985_v11 = vld [vmem:[%s1425_s7] ss:$0 sm:$0xff] (!%p721_p0) }
 0x24d   : > { %1068 = vmatpush3.bf16.msra.mxu0 (!%p721_p0), %v727_v59  ;;  %1080 = vmatpush3.bf16.msra.mxu1 (!%p721_p0), %v1173_v60 }
 0x24e   : > { %1069 = vmatprep.subr.bf16.mxu0 %v1221_v57  ;;  %1081 = vmatprep.subr.bf16.mxu1 %v1221_v57 }
 0x251   : > { %1070 = vmatpush3.bf16.msra.mxu0 %v728_v61  ;;  %1082 = vmatpush3.bf16.msra.mxu1 %v1174_v62 }
 0x252   : > { %1071 = vmatprep.subr.bf16.mxu0 %v1221_v57  ;;  %1083 = vmatprep.subr.bf16.mxu1 %v1221_v57 }
 0x255   : > { %1072 = vmatpush3.bf16.msra.mxu0 %v729_v63  ;;  %1084 = vmatpush3.bf16.msra.mxu1 %v1175_v0 }
 0x256   : > { %1085 = vmatprep.subr.bf16.mxu1 %v1221_v57 }
 0x258   : > { %1074 = vmatmul.mubr.msk.bf16.vlgmr.msra.gmra.mrb[0].mxu0 %vm560_vm0, %v725_v1 }
 0x259   : > { %1086 = vmatpush3.bf16.msra.mxu1 %v1176_v2 }
 0x25a   : > { %1087 = vmatprep.subr.bf16.mxu1 %v1221_v57 }
 0x25d   : > { %1088 = vmatpush3.bf16.msra.mxu1 %v1177_v3 }
 0x25e   : > { %1089 = vmatprep.subr.bf16.mxu1 %v1221_v57 }
 0x261   : > { %1090 = vmatpush3.bf16.msra.mxu1 %v1178_v4 }
 0x262   : > { %1091 = vmatprep.subr.bf16.mxu1 %v1221_v57 }
 0x265   : > { %1092 = vmatpush3.bf16.msra.mxu1 %v1179_v5 }
 0x32b   : > { %v767_v6 = vpop.f32.mrb[0].mxu0 }
 0x32c   : > { %v773_v7 = vpack.c.bf16 %v767_v6, %v767_v6  ;;  %v1075_v8 = vpop.f32.mrb[1].mxu0 }
 0x32d   : > { %v770_v9 = vpop.f32.mrb[2].mxu0 }
 0x32e   : > { %v1076_v10 = vpop.f32.mrb[3].mxu0  ;;  %1094 = vmatmul.mubr.bf16.vlgmr.msra.gmra.mrb[0].mxu1 %v773_v7 }
 0x401   : > { %v879_v12 = vpop.f32.mrb[0].mxu1 }
 0x402   : > { %v880_v13 = vadd.f32 %v985_v11, %v879_v12  ;;  %v1095_v14 = vpop.f32.mrb[1].mxu1 }
 0x403   : > { %v882_v15 = vpop.f32.mrb[2].mxu1 }
 0x404   : > { %885 = vst [vmem:[%s1426_s8] sm:$0xff] %v880_v13  ;;  %v1096_v16 = vpop.f32.mrb[3].mxu1 }
 0x405 PF: > { %s18_s9 = sadd.s32 1, %s1218_s9   ;;  %s1428_s16 = sld [smem:[#allocation7_spill]] }
 0x406   : > { %p15_p1 = scmp.ge.s32.totalorder %s18_s9, 8   ;;  %s1429_s27 = smov %s1210_s29 }
 0x407   : > { %s1430_s28 = smov %s1214_s30  ;;  %s1431_s29 = smov %s1434_s10 }
 0x408   :  { %17 = sbr.rel (!%p15_p1) target bundleno = 3 (0x3), region = 104 }
 0x40b   : > { %s1432_s30 = smov %s1428_s16 }

</bundles_post_ra>
